<compile_context>
chip_gen: v5e
topology: v5e:2x2
jax: 0.10.0
libtpu: 0.0.40
codegen_flags: <defaults>
</compile_context>

<pallas_src>
import math

import jax
import jax.numpy as jnp
from jax import lax
from jax.experimental import pallas as pl
from jax.experimental.pallas import tpu as pltpu


# --------------------------------------------------------------------------- #
# Projection pre-pass: fused phi / g 1x1 convs, done once per KV position.    #
# --------------------------------------------------------------------------- #
def _make_proj_kernel(c2):
    def kernel(x_ref, wpg_ref, bpg_ref, phi_ref, gt_ref):
        x = x_ref[0].astype(jnp.bfloat16)                              # (C, T)
        pg = jnp.dot(wpg_ref[...], x,
                     preferred_element_type=jnp.float32) + bpg_ref[...]  # (2*C2, T) f32
        phi_ref[0] = pg[:c2].astype(jnp.bfloat16)                      # (C2, T)
        # g is emitted pre-transposed so the PV matmul in the flash kernel is a
        # plain (TQ,TK)@(TK,C2) with no per-KV-step transpose.
        gt_ref[0] = jnp.transpose(pg[c2:]).astype(jnp.bfloat16)        # (T, C2)
    return kernel


# --------------------------------------------------------------------------- #
# Flash-style NonLocal attention + final 1x1 conv + residual.                 #
# --------------------------------------------------------------------------- #
def _make_nonlocal_kernel(c2, n_actual, n_padded, tk):
    needs_mask = n_padded != n_actual
    neg_big = -1e30   # finite "minus infinity" so masked columns never NaN

    def kernel(xq_ref, phi_ref, gt_ref, wt_ref, bt_ref, wf_ref, bf_ref,
               o_ref, theta_sc, m_sc, l_sc, acc_sc):
        ki = pl.program_id(2)
        last = pl.num_programs(2) - 1

        # --- per-Q-tile init: theta projection + online-softmax state --------
        @pl.when(ki == 0)
        def _():
            xq = xq_ref[0].astype(jnp.bfloat16)                        # (C, TQ)
            th = jnp.dot(wt_ref[...], xq,
                         preferred_element_type=jnp.float32) + bt_ref[...]  # (C2, TQ)
            # One small transpose per Q tile so the logits matmul is a standard
            # (TQ,C2) @ (C2,TK) with no per-KV-step transposes.
            theta_sc[...] = jnp.transpose(th).astype(jnp.bfloat16)     # (TQ, C2)
            m_sc[...] = jnp.full_like(m_sc, -jnp.inf)
            l_sc[...] = jnp.zeros_like(l_sc)
            acc_sc[...] = jnp.zeros_like(acc_sc)

        # --- logits: bf16 MXU matmul with f32 accumulation --------------------
        s = jnp.dot(theta_sc[...], phi_ref[0],
                    preferred_element_type=jnp.float32)                # (TQ, TK)

        if needs_mask:
            # Tiles are chosen so padding < TK: only the last KV tile can hold
            # padded columns, so the mask is confined to that single step.
            def _mask(sv):
                col = ki * tk + lax.broadcasted_iota(jnp.int32, sv.shape, 1)
                return jnp.where(col < n_actual, sv, neg_big)
            s = lax.cond(ki == last, _mask, lambda sv: sv, s)

        # --- online softmax: bf16 exp (EUP), f32 accumulation ------------------
        m_new = jnp.maximum(m_sc[...], jnp.max(s, axis=-1, keepdims=True))
        alpha = jnp.exp(m_sc[...] - m_new)
        p = jnp.exp((s - m_new).astype(jnp.bfloat16))                  # (TQ, TK) bf16
        # denominator and numerator built from the SAME bf16 p (consistency).
        l_sc[...] = alpha * l_sc[...] + jnp.sum(p, axis=-1, keepdims=True,
                                                dtype=jnp.float32)
        acc_sc[...] = alpha * acc_sc[...] + jnp.dot(
            p, gt_ref[0], preferred_element_type=jnp.float32)          # (TQ, C2)
        m_sc[...] = m_new

        # --- finalize: normalize, final 1x1 conv, residual ---------------------
        @pl.when(ki == last)
        def _():
            att = (acc_sc[...] *
                   pl.reciprocal(l_sc[...], approx=True)).astype(jnp.bfloat16)  # (TQ, C2)
            out_ct = lax.dot_general(
                wf_ref[...], att, (((1,), (1,)), ((), ())),
                preferred_element_type=jnp.float32) + bf_ref[...]      # (C, TQ)
            o_ref[0] = xq_ref[0] + out_ct

    return kernel


# --------------------------------------------------------------------------- #
# Wrapper                                                                     #
# --------------------------------------------------------------------------- #
def _round_up(x, m):
    return ((x + m - 1) // m) * m


def _pick_tile(n, cap=512):
    """Largest power-of-two tile in [128, cap] not exceeding round_up(n, 128)."""
    n128 = _round_up(n, 128)
    t = 128
    while t * 2 <= min(cap, n128):
        t *= 2
    return t


def nonlocal_forward(x_nchw, params, *, tq=None, tk=None):
    """x_nchw: (B, C, H, W) float32. params: dict of 1x1 conv weights/biases."""
    b, c, h, w = x_nchw.shape
    c2 = c // 2
    n = h * w

    if tk is None:
        tk = _pick_tile(n)
    if tq is None:
        tq = _pick_tile(n)
        # v7x shards the parallel grid axes over 2 TensorCores: keep at least
        # two units of (batch x Q-tile) work when the shape allows it.
        while b * (_round_up(n, max(tq, tk)) // tq) < 2 and tq > 128:
            tq //= 2
    assert tq % 128 == 0 and tk % 128 == 0

    n_padded = _round_up(n, math.lcm(tq, tk))
    # A KV tile must never be fully padding, or the online softmax degenerates.
    assert n_padded - n < tk, "padding must stay smaller than the KV tile"

    # NCHW -> (B, C, N) is a pure reshape (no HBM transpose pass).
    x_cn = x_nchw.reshape(b, c, n)
    if n_padded != n:
        x_cn = jnp.pad(x_cn, ((0, 0), (0, 0), (0, n_padded - n)))

    # 1x1-conv weights (Cout, Cin, 1, 1) -> (Cout, Cin); pre-cast to bf16 so all
    # matmuls are native bf16 MXU ops (f32xf32 is emulated ~3x slower).
    wt = params["w_theta"].reshape(c2, c).astype(jnp.bfloat16)
    wpg = jnp.concatenate([params["w_phi"].reshape(c2, c),
                           params["w_g"].reshape(c2, c)],
                          axis=0).astype(jnp.bfloat16)                 # (2*C2, C)
    wf = params["w_final"].reshape(c, c2).astype(jnp.bfloat16)
    bt = params["b_theta"].reshape(c2, 1).astype(jnp.float32)
    bpg = jnp.concatenate([params["b_phi"],
                           params["b_g"]]).reshape(2 * c2, 1).astype(jnp.float32)
    bf = params["b_final"].reshape(c, 1).astype(jnp.float32)

    # ---- pre-pass: phi / g projections, once per KV position ----------------
    phi_all, gt_all = pl.pallas_call(
        _make_proj_kernel(c2),
        out_shape=(jax.ShapeDtypeStruct((b, c2, n_padded), jnp.bfloat16),
                   jax.ShapeDtypeStruct((b, n_padded, c2), jnp.bfloat16)),
        grid=(b, n_padded // tk),
        in_specs=[
            pl.BlockSpec((1, c, tk), lambda bi, ti: (bi, 0, ti)),
            pl.BlockSpec((2 * c2, c), lambda bi, ti: (0, 0)),
            pl.BlockSpec((2 * c2, 1), lambda bi, ti: (0, 0)),
        ],
        out_specs=(
            pl.BlockSpec((1, c2, tk), lambda bi, ti: (bi, 0, ti)),
            pl.BlockSpec((1, tk, c2), lambda bi, ti: (bi, ti, 0)),
        ),
        compiler_params=pltpu.CompilerParams(
            dimension_semantics=("parallel", "parallel")),
    )(x_cn, wpg, bpg)

    # ---- flash-style attention + final conv + residual -----------------------
    full = lambda a: pl.BlockSpec(a.shape, lambda bi, qi, ki: (0,) * a.ndim)
    grid = (b, n_padded // tq, n_padded // tk)
    kernel = _make_nonlocal_kernel(c2, n, n_padded, tk)

    out_cn = pl.pallas_call(
        kernel,
        out_shape=jax.ShapeDtypeStruct((b, c, n_padded), jnp.float32),
        grid_spec=pltpu.PrefetchScalarGridSpec(
            num_scalar_prefetch=0,
            grid=grid,
            in_specs=[
                pl.BlockSpec((1, c, tq), lambda bi, qi, ki: (bi, 0, qi)),   # x (theta + residual)
                pl.BlockSpec((1, c2, tk), lambda bi, qi, ki: (bi, 0, ki)),  # phi tile (bf16)
                pl.BlockSpec((1, tk, c2), lambda bi, qi, ki: (bi, ki, 0)),  # g^T tile (bf16)
                full(wt), full(bt), full(wf), full(bf),
            ],
            out_specs=pl.BlockSpec((1, c, tq), lambda bi, qi, ki: (bi, 0, qi)),
            scratch_shapes=[
                pltpu.VMEM((tq, c2), jnp.bfloat16),   # theta^T for this Q tile
                pltpu.VMEM((tq, 1), jnp.float32),     # running max
                pltpu.VMEM((tq, 1), jnp.float32),     # running denom
                pltpu.VMEM((tq, c2), jnp.float32),    # output accumulator
            ],
        ),
        compiler_params=pltpu.CompilerParams(
            dimension_semantics=("parallel", "parallel", "arbitrary")),
    )(x_cn, phi_all, gt_all, wt, bt, wf, bf)

    if n_padded != n:
        out_cn = out_cn[:, :, :n]
    # (B, C, N) -> NCHW is again a pure reshape.
    return out_cn.reshape(b, c, h, w)


# --------------------------------------------------------------------------- #
# Params + pure-JAX reference (f32) mirroring the PyTorch forward.            #
# --------------------------------------------------------------------------- #
def init_params(key, channel):
    c2 = channel // 2
    ks = jax.random.split(key, 8)
    scale_in = 1.0 / jnp.sqrt(channel)
    scale_mid = 1.0 / jnp.sqrt(c2)
    return {
        "w_theta": scale_in * jax.random.normal(ks[0], (c2, channel, 1, 1), jnp.float32),
        "b_theta": scale_in * jax.random.normal(ks[1], (c2,), jnp.float32),
        "w_phi":   scale_in * jax.random.normal(ks[2], (c2, channel, 1, 1), jnp.float32),
        "b_phi":   scale_in * jax.random.normal(ks[3], (c2,), jnp.float32),
        "w_g":     scale_in * jax.random.normal(ks[4], (c2, channel, 1, 1), jnp.float32),
        "b_g":     scale_in * jax.random.normal(ks[5], (c2,), jnp.float32),
        "w_final": scale_mid * jax.random.normal(ks[6], (channel, c2, 1, 1), jnp.float32),
        "b_final": scale_mid * jax.random.normal(ks[7], (channel,), jnp.float32),
    }


def reference_forward(x_nchw, params):
    b, c, h, w = x_nchw.shape
    c2 = c // 2
    n = h * w

    def proj(wkey, bkey):
        wmat = params[wkey].reshape(-1, params[wkey].shape[1])   # (Cout, Cin)
        return (jnp.einsum("oc,bchw->bohw", wmat, x_nchw)
                + params[bkey][None, :, None, None])

    theta = proj("w_theta", "b_theta").reshape(b, c2, n).transpose(0, 2, 1)  # (b, N, c2)
    phi = proj("w_phi", "b_phi").reshape(b, c2, n)                           # (b, c2, N)
    g = proj("w_g", "b_g").reshape(b, c2, n).transpose(0, 2, 1)              # (b, N, c2)
    tp = jnp.matmul(theta, phi)
    sm = jax.nn.softmax(tp, axis=-1)
    tpg = jnp.matmul(sm, g)                                                  # (b, N, c2)
    tpg = tpg.transpose(0, 2, 1).reshape(b, c2, h, w)
    wfm = params["w_final"].reshape(c, c2)
    fin = (jnp.einsum("oc,bchw->bohw", wfm, tpg)
           + params["b_final"][None, :, None, None])
    return x_nchw + fin


if __name__ == "__main__":
    key = jax.random.PRNGKey(0)
    k_x, k_p = jax.random.split(key)

    B, C, H, W = 2, 8, 16, 16          # N = 256
    x = jax.random.normal(k_x, (B, C, H, W), jnp.float32)
    params = init_params(k_p, C)

    # tq=tk=128 so this small test exercises the multi-tile online-softmax path
    # (flash grid = (2, 2, 2)); larger shapes auto-pick 256/512 tiles.
    out = jax.block_until_ready(nonlocal_forward(x, params, tq=128, tk=128))
    ref = jax.block_until_ready(reference_forward(x, params))

    assert out.shape == (B, C, H, W)
    # bf16 MXU operands + bf16 exp inside the kernel -> compare against the f32
    # reference with a correspondingly loose tolerance (real bugs show as O(1)).
    assert jnp.allclose(out, ref, atol=1e-1, rtol=1e-1), (
        "mismatch vs reference, max abs diff = "
        f"{float(jnp.max(jnp.abs(out - ref))):.3e}")

    print("KERNEL_OK")
</pallas_src>

<mosaic_0001>
module attributes {stable_mosaic.version = 11 : i64} {
  func.func @kernel(%arg0: i32, %arg1: i32, %arg2: memref<1x8x128xf32, #tpu.memory_space<vmem>>, %arg3: memref<8x8xbf16, #tpu.memory_space<vmem>>, %arg4: memref<8x1xf32, #tpu.memory_space<vmem>>, %arg5: memref<1x4x128xbf16, #tpu.memory_space<vmem>>, %arg6: memref<1x128x4xbf16, #tpu.memory_space<vmem>>) attributes {dimension_semantics = [#tpu.dimension_semantics<parallel>, #tpu.dimension_semantics<parallel>], iteration_bounds = array<i64: 2, 2>, scalar_prefetch = 0 : i64, scratch_operands = 0 : i64, tpu.core_type = #tpu.core_type<tc>, window_params = [{transform_indices = @transform_0, window_bounds = array<i64: 1, 8, 128>}, {pipeline_mode = #tpu.pipeline_mode<synchronous>, transform_indices = @transform_1, window_bounds = array<i64: 8, 8>}, {pipeline_mode = #tpu.pipeline_mode<synchronous>, transform_indices = @transform_2, window_bounds = array<i64: 8, 1>}, {transform_indices = @transform_3, window_bounds = array<i64: 1, 4, 128>}, {transform_indices = @transform_4, window_bounds = array<i64: 1, 128, 4>}]} {
    %c0 = arith.constant 0 : index
    %c0_0 = arith.constant 0 : index
    %c0_1 = arith.constant 0 : index
    %0 = vector.load %arg2[%c0, %c0_0, %c0_1] : memref<1x8x128xf32, #tpu.memory_space<vmem>>, vector<1x8x128xf32>
    %1 = vector.shape_cast %0 : vector<1x8x128xf32> to vector<8x128xf32>
    %2 = arith.truncf %1 : vector<8x128xf32> to vector<8x128xbf16>
    %c0_2 = arith.constant 0 : index
    %c0_3 = arith.constant 0 : index
    %3 = vector.load %arg3[%c0_2, %c0_3] : memref<8x8xbf16, #tpu.memory_space<vmem>>, vector<8x8xbf16>
    %cst = arith.constant dense<0.000000e+00> : vector<8x128xf32>
    %4 = tpu.matmul %3, %2, %cst {dimension_numbers = #tpu.dot_dimension_numbers<[1], [0], [0], [1], [0, 0, 1, 1], [], []>} : vector<8x8xbf16>, vector<8x128xbf16>, vector<8x128xf32> -> vector<8x128xf32>
    %c0_4 = arith.constant 0 : index
    %c0_5 = arith.constant 0 : index
    %5 = vector.load %arg4[%c0_4, %c0_5] : memref<8x1xf32, #tpu.memory_space<vmem>>, vector<8x1xf32>
    %6 = vector.broadcast %5 : vector<8x1xf32> to vector<8x128xf32>
    %7 = arith.addf %4, %6 : vector<8x128xf32>
    %8 = vector.extract_strided_slice %7 {offsets = [0, 0], sizes = [4, 128], strides = [1, 1]} : vector<8x128xf32> to vector<4x128xf32>
    %9 = arith.truncf %8 : vector<4x128xf32> to vector<4x128xbf16>
    %c0_6 = arith.constant 0 : index
    %c0_7 = arith.constant 0 : index
    %c0_8 = arith.constant 0 : index
    %10 = vector.load %arg5[%c0_6, %c0_7, %c0_8] : memref<1x4x128xbf16, #tpu.memory_space<vmem>>, vector<1x4x128xbf16>
    %11 = vector.shape_cast %10 : vector<1x4x128xbf16> to vector<4x128xbf16>
    %12 = vector.shape_cast %9 : vector<4x128xbf16> to vector<1x4x128xbf16>
    tpu.vector_store %arg5[%c0_6, %c0_7, %c0_8], %12 {strides = array<i32>} : memref<1x4x128xbf16, #tpu.memory_space<vmem>>, vector<1x4x128xbf16>,
    %13 = vector.extract_strided_slice %7 {offsets = [4, 0], sizes = [4, 128], strides = [1, 1]} : vector<8x128xf32> to vector<4x128xf32>
    %14 = tpu.transpose %13, [1, 0] : vector<4x128xf32> -> vector<128x4xf32>
    %15 = arith.truncf %14 : vector<128x4xf32> to vector<128x4xbf16>
    %c0_9 = arith.constant 0 : index
    %c0_10 = arith.constant 0 : index
    %c0_11 = arith.constant 0 : index
    %16 = vector.load %arg6[%c0_9, %c0_10, %c0_11] : memref<1x128x4xbf16, #tpu.memory_space<vmem>>, vector<1x128x4xbf16>
    %17 = vector.shape_cast %16 : vector<1x128x4xbf16> to vector<128x4xbf16>
    %18 = vector.shape_cast %15 : vector<128x4xbf16> to vector<1x128x4xbf16>
    tpu.vector_store %arg6[%c0_9, %c0_10, %c0_11], %18 {strides = array<i32>} : memref<1x128x4xbf16, #tpu.memory_space<vmem>>, vector<1x128x4xbf16>,
    return
  }
  func.func @transform_0(%arg0: i32, %arg1: i32) -> (i32, i32, i32) {
    %c0_i32 = arith.constant 0 : i32
    %c0_i32_0 = arith.constant 0 : i32
    return %arg0, %c0_i32, %arg1 : i32, i32, i32
  }
  func.func @transform_1(%arg0: i32, %arg1: i32) -> (i32, i32) {
    %c0_i32 = arith.constant 0 : i32
    %c0_i32_0 = arith.constant 0 : i32
    %c0_i32_1 = arith.constant 0 : i32
    return %c0_i32, %c0_i32_0 : i32, i32
  }
  func.func @transform_2(%arg0: i32, %arg1: i32) -> (i32, i32) {
    %c0_i32 = arith.constant 0 : i32
    %c0_i32_0 = arith.constant 0 : i32
    %c0_i32_1 = arith.constant 0 : i32
    return %c0_i32, %c0_i32_0 : i32, i32
  }
  func.func @transform_3(%arg0: i32, %arg1: i32) -> (i32, i32, i32) {
    %c0_i32 = arith.constant 0 : i32
    %c0_i32_0 = arith.constant 0 : i32
    return %arg0, %c0_i32, %arg1 : i32, i32, i32
  }
  func.func @transform_4(%arg0: i32, %arg1: i32) -> (i32, i32, i32) {
    %c0_i32 = arith.constant 0 : i32
    %c0_i32_0 = arith.constant 0 : i32
    return %arg0, %arg1, %c0_i32 : i32, i32, i32
  }
}

</mosaic_0001>

<bundles_post_ra>
// kernel: tpu_custom_call.1
= control target key start
LH: loop header
LB: loop body
LE: loop exit
PB: predicated region body
PF: predicated region fallthrough
CT: control target
= control target key end

     0   :  { %s956_s0 = inlined_call_operand.hbm [shape: f32[2,8,256], index: 0, kind: input, shape index: {}]   ;;  %s957_s1 = inlined_call_operand.vmem [shape: bf16[8,8], index: 1, kind: input, shape index: {}]   ;;  %s958_s2 = inlined_call_operand.vmem [shape: f32[8,1], index: 2, kind: input, shape index: {}]   ;;  %s959_s3 = inlined_call_operand.hbm [shape: bf16[2,4,256], index: 3, kind: output, shape index: {0}]   ;;  %s960_s4 = inlined_call_operand.vmem [shape: bf16[2,256,4], index: 4, kind: output, shape index: {1}]  }
   0x1   :  { %963 = sst [smem:[#allocation10_spill]] %s956_s0 }
   0x2   :  { %964 = sst [smem:[#allocation11_spill]] %s957_s1 }
   0x3   :  { %10 = vsyncpa [#allocation3], 0 }
   0x4   :  { %12 = vsyncpa [#allocation3 + $0x1], 0 }
   0x5   :  { %13 = vsyncpa [#allocation4], 0 }
   0x6   :  { %15 = vsyncpa [#allocation4 + $0x1], 0  ;;  %s767_s15 = smov 0   ;;  %s769_s16 = smov 0  }
   0x7   :  { %s771_s17 = smov 0   ;;  %s773_s18 = smov 0  }
   0x8   :  { %s775_s19 = smov 0   ;;  %s777_s20 = smov 0  }
   0x9   :  { %s779_s21 = smov 0   ;;  %s781_s22 = smov 0  }
   0xa LB: > { %s511_s23 = sadd.s32 4294967295, %s739_s22   ;;  %s512_s24 = sadd.s32 4294967294, %s739_s22   ;;  %s739_s22 = sphi %s781_s22, %s21_s22   ;;  %s735_s21 = sphi %s779_s21, %s981_s21   ;;  %s731_s20 = sphi %s777_s20, %s980_s20   ;;  %s727_s19 = sphi %s775_s19, %s979_s19   ;;  %s723_s18 = sphi %s773_s18, %s978_s18   ;;  %s719_s17 = sphi %s771_s17, %s977_s17   ;;  %s715_s16 = sphi %s769_s16, %s976_s16   ;;  %s711_s15 = sphi %s767_s15, %s975_s15  }
   0xb   : > { %s30_s25 = sadd.s32 1, %s731_s20  ;;  %s33_s26 = sadd.s32 1, %s735_s21 }
   0xc   : > { %p31_p0 = scmp.ge.s32.totalorder %s30_s25, 2  ;;  %s42_s27 = sadd.s32 1, %s719_s17 }
   0xd   : > { %p49_p1 = scmp.ne.s32.totalorder %s719_s17, %s715_s16  ;;  %p50_p2 = scmp.eq.s32.totalorder %s739_s22, 0 }
   0xe   : > { %s983_s25 = smov (%p31_p0, %s30_s25), 0  ;;  %s985_s26 = smov (!%p31_p0, %s33_s26), %s735_s21 }
   0xf   : > { %965 = sst [smem:[#allocation8_spill]] %s983_s25  ;;  %s38_s28 = ssub.s32 %s731_s20, %s983_s25 }
  0x10   : > { %p820_p3 = por %p50_p2, %p49_p1  ;;  %p35_p4 = scmp.ge.s32.totalorder %s985_s26, 2 }
  0x11   : > { %p55_p5 = scmp.ne.s32.totalorder %s715_s16, %s711_s15  ;;  %p56_p6 = scmp.eq.s32.totalorder %s511_s23, 0 }
  0x12   : > { %p123_p7 = scmp.eq.s32.totalorder %s511_s23, 3  ;;  %s987_s26 = smov (%p35_p4, %s985_s26), 0 }
  0x13   : > { %967 = sst [smem:[#allocation9_spill]] %s987_s26  ;;  %p828_p8 = por %p56_p6, %p55_p5 }
  0x14   : > { %p832_p9 = por %p123_p7, %p49_p1  ;;  %s37_s6 = ssub.s32 %s735_s21, %s987_s26 }
  0x15   : > { %p129_p10 = scmp.eq.s32.totalorder %s512_s24, 3  ;;  %s39_s7 = sor.u32 %s38_s28, %s37_s6 }
  0x16   : > { %p40_p11 = scmp.eq.s32.totalorder %s39_s7, 0  ;;  %p542_p13 = scmp.lt.s32.totalorder %s739_s22, 4 }
  0x17   : > { %p838_p12 = por %p129_p10, %p55_p5  ;;  %s183_s9 = sand.u32 1, %s719_s17  }
  0x18   : > { %s845_s10 = scalar_select %p40_p11, %s719_s17, %s42_s27  }
  0x19   : > { %s515_s11 = sshll.u32 %s183_s9, 3  ;;  %s516_s12 = sshll.u32 %s735_s21, 1 }
  0x1a   : > { %s191_s13 = sadd.s32 %s731_s20, %s516_s12  ;;  %s187_s14 = scalar_lea.vmem [#allocation2], %s515_s11 }
  0x1b   : > { %s197_s23 = sshll.u32 %s187_s14, 4  ;;  %s517_s26 = sshll.u32 %s191_s13, 3  ;;  %s198_s23 = int_to_ptr.vmem [resolvable:$true] %s197_s23 }
  0x1c   : > { %s971_s0 = sld [smem:[#allocation10_spill]]  ;;  %p535_p0 = pnand %p542_p13, %p820_p3 }
  0x1d   : > { %p518_p1 = scmp.ge.s32.totalorder %s739_s22, 1  ;;  %s184_s25 = scalar_lea.sflag [#allocation3], %s183_s9 }
  0x1e   : > { %p202_p2 = scmp.lt.s32.totalorder %s739_s22, 5 }
  0x20   : > { %p203_p4 = pnand %p518_p1, %p202_p2 }
  0x21   : > { %s857_s27 = sand.u32 (!%p203_p4), 1, %s715_s16  }
  0x22   : > { %s193_s6 = scalar_lea.hbm %s971_s0, %s517_s26  ;;  %206 = sbr.rel (%p203_p4) target bundleno = 465 (0x1d1), region = 32 }
  0x23   : > { %s195_s7 = sshll.u32 %s193_s6, 4  ;;  %s519_s11 = sshll.u32 (!%p203_p4), %s857_s27, 3  ;;  %s196_s7 = int_to_ptr.hbm [resolvable:$true] %s195_s7 }
  0x24   : > { %537 = dma.hbm_to_vmem [thread:$0]  (!%p535_p0), %s196_s7, 128, %s198_s23, %s184_s25  }
  0x25   : > { %s209_s12 = scalar_lea.sflag (!%p203_p4), [#allocation3], %s857_s27  ;;  %s212_s13 = scalar_lea.vmem (!%p203_p4), [#allocation2], %s519_s11 }
  0x27   : > { %702 = dma.done.wait (%p828_p8), %s209_s12, 128  }
  0x28   : > { %704 = vsyncadd (%p828_p8), %s209_s12, 4294967168  ;;  %v741_v0 = vmov 0   ;;  %v258_v1 = vld [vmem:[%s212_s13] sm:$0xff]  ;;  %vm271_vm0 = vcmask 1043456   ;;  %s972_s1 = sld [smem:[#allocation11_spill]]  ;;  %vm267_vm1 = vcmask 64512  }
  0x29   : > { %610 = vset.pattern.permute.xlu0 %v741_v0  ;;  %v261_v2 = vld [vmem:[%s958_s2] sm:$0xff]  ;;  %v259_v3 = vpack.c.bf16 %v258_v1, %v258_v1  ;;  %s520_s30 = sshll.u32 %s857_s27, 1  ;;  %s521_s23 = sshll.u32 %s723_s18, 4 }
  0x2a   : > { %264 = vperm.xlu0 %610, %v261_v2   ;;  %s235_s14 = scalar_lea.vmem [#allocation5], %s520_s30  ;;  %p248_p3 = scmp.lt.s32.totalorder %s727_s19, 1 }
  0x2b   : > { %v273_v4 = vsel %vm271_vm0, %v259_v3, 0  ;;  %p250_p5 = scmp.lt.s32.totalorder %s521_s23, 31  ;;  %s526_s6 = sshll.u32 %s727_s19, 1 }
  0x2c   : > { %282 = vmatpush.bf16.msra.mxu0 %v273_v4  ;;  %s249_s24 = scalar_select %p248_p3, %s727_s19, 1 }
  0x2d   : > { %s989_s23 = smov (!%p250_p5, %s521_s23), 31  ;;  %s378_s7 = sadd.s32 %s723_s18, %s526_s6 }
  0x2e   : > { %v260_v5 = vld [vmem:[%s972_s1] sm:$0xf]  ;;  %s522_s28 = sshll.u32 %s249_s24, 5  ;;  %s527_s11 = sshll.u32 %s378_s7, 1 }
  0x2f   : > { %524 = vmatmul.msk.bf16.vlgmr.msra.gmra.mxu0 %vm267_vm1, %v260_v5  ;;  %s253_s12 = sadd.s32 %s522_s28, %s989_s23  ;;  %s380_s26 = scalar_lea.hbm %s959_s3, %s527_s11 }
  0x30   : > { %s382_s29 = sshll.u32 %s235_s14, 4  ;;  %s384_s9 = sshll.u32 %s380_s26, 4  ;;  %s383_s29 = int_to_ptr.vmem [resolvable:$true] %s382_s29  ;;  %s385_s9 = int_to_ptr.hbm [resolvable:$true] %s384_s9 }
  0x31   : > { %s359_s30 = scalar_lea.sflag [#allocation4], %s857_s27  ;;  %s655_s0 = sshra.s32 %s385_s9, 4  ;;  %s656_s0 = int_to_ptr.hbm [resolvable:$true] %s655_s0 }
  0x32   : > { %s657_s1 = scalar_lea.hbm %s656_s0, 2  ;;  %s661_s23 = scalar_lea.hbm %s959_s3, 8 }
  0x33   : > { %p658_p6 = scmp.ne.s32.totalorder %s656_s0, %s657_s1  ;;  %p662_p10 = scmp.lt.s32.totalorder %s656_s0, %s959_s3 }
  0x34   : > { %p663_p11 = scmp.lt.s32.totalorder %s661_s23, %s657_s1 }
  0x35   : > { %p659_p7 = pnand %p658_p6, %p832_p9 }
  0x36   : > { %p664_p13 = por %p663_p11, %p662_p10 }
  0x37   : > { %p660_p8 = pneg %p659_p7 }
  0x39   : > { %p665_p0 = pnand %p664_p13, %p660_p8 }
  0x9c   : > { %v265_v6 = vpop.permute.xlu0 %264 }
  0xac   : > { %v284_v7 = vpop.f32.mrf.mxu0 }
  0xad   : > { %v285_v8 = vadd.f32 %v284_v7, %v265_v6 }
  0xaf   : > { %v288_v9 = vpack.c.bf16 %v285_v8, %v285_v8  ;;  %v291_v10 = vrot.slane %v285_v8, 4 }
  0xb1   : > { %293 = vxpose.xlu0.b32.start.end [1/1] (short) %v291_v10, 128  ;;  %289 = vst [vmem:[%s235_s14] sm:$0x3] %v288_v9 }
  0xb4   : > { %v286_v11 = vpop.f32.mrf.mxu0 }
  0xb5   : > { %668 = shalt.err (!%p665_p0)
}
  0xb6   : > { %532 = dma.vmem_to_hbm [thread:$0]  (%p832_p9), %s383_s29, 32, %s385_s9, %s359_s30   ;;  %vm341_vm2 = vcmask 27648  }
  0xb7   : > { %s523_s27 = sshll.u32 %s253_s12, 2 }
  0xb8   : > { %s894_s7 = scalar_lea.vmem %s960_s4, %s523_s27 }
 0x155   : > { %v309_v12 = vpop.trf.xlu0 }
 0x156   : > { %v325_v13 = vpack.c.bf16 %v309_v12, %v309_v12 }
 0x158   : > { %342 = vst.msk [vmem:[%s894_s7] sm:$0xf] %vm341_vm2, %v325_v13 }
 0x15d   : > { %v310_v14 = vpop.trf.xlu0 }
 0x15e   : > { %v326_v15 = vpack.c.bf16 %v310_v14, %v310_v14 }
 0x160   : > { %343 = vst.msk [vmem:[%s894_s7 + $0x4] sm:$0xf] %vm341_vm2, %v326_v15 }
 0x165   : > { %v311_v16 = vpop.trf.xlu0 }
 0x166   : > { %v327_v17 = vpack.c.bf16 %v311_v16, %v311_v16 }
 0x168   : > { %344 = vst.msk [vmem:[%s894_s7 + $0x8] sm:$0xf] %vm341_vm2, %v327_v17 }
 0x16d   : > { %v312_v18 = vpop.trf.xlu0 }
 0x16e   : > { %v328_v19 = vpack.c.bf16 %v312_v18, %v312_v18 }
 0x170   : > { %345 = vst.msk [vmem:[%s894_s7 + $0xc] sm:$0xf] %vm341_vm2, %v328_v19 }
 0x175   : > { %v313_v20 = vpop.trf.xlu0 }
 0x176   : > { %v329_v21 = vpack.c.bf16 %v313_v20, %v313_v20 }
 0x178   : > { %346 = vst.msk [vmem:[%s894_s7 + $0x10] sm:$0xf] %vm341_vm2, %v329_v21 }
 0x17d   : > { %v314_v22 = vpop.trf.xlu0 }
 0x17e   : > { %v330_v23 = vpack.c.bf16 %v314_v22, %v314_v22 }
 0x180   : > { %347 = vst.msk [vmem:[%s894_s7 + $0x14] sm:$0xf] %vm341_vm2, %v330_v23 }
 0x185   : > { %v315_v24 = vpop.trf.xlu0 }
 0x186   : > { %v331_v25 = vpack.c.bf16 %v315_v24, %v315_v24 }
 0x188   : > { %348 = vst.msk [vmem:[%s894_s7 + $0x18] sm:$0xf] %vm341_vm2, %v331_v25 }
 0x18d   : > { %v316_v26 = vpop.trf.xlu0 }
 0x18e   : > { %v332_v27 = vpack.c.bf16 %v316_v26, %v316_v26 }
 0x190   : > { %349 = vst.msk [vmem:[%s894_s7 + $0x1c] sm:$0xf] %vm341_vm2, %v332_v27 }
 0x195   : > { %v317_v28 = vpop.trf.xlu0 }
 0x196   : > { %v333_v29 = vpack.c.bf16 %v317_v28, %v317_v28 }
 0x198   : > { %350 = vst.msk [vmem:[%s894_s7 + $0x20] sm:$0xf] %vm341_vm2, %v333_v29 }
 0x19d   : > { %v318_v30 = vpop.trf.xlu0 }
 0x19e   : > { %v334_v31 = vpack.c.bf16 %v318_v30, %v318_v30 }
 0x1a0   : > { %351 = vst.msk [vmem:[%s894_s7 + $0x24] sm:$0xf] %vm341_vm2, %v334_v31 }
 0x1a5   : > { %v319_v32 = vpop.trf.xlu0 }
 0x1a6   : > { %v335_v33 = vpack.c.bf16 %v319_v32, %v319_v32 }
 0x1a8   : > { %352 = vst.msk [vmem:[%s894_s7 + $0x28] sm:$0xf] %vm341_vm2, %v335_v33 }
 0x1ad   : > { %v320_v34 = vpop.trf.xlu0 }
 0x1ae   : > { %v336_v35 = vpack.c.bf16 %v320_v34, %v320_v34 }
 0x1b0   : > { %353 = vst.msk [vmem:[%s894_s7 + $0x2c] sm:$0xf] %vm341_vm2, %v336_v35 }
 0x1b5   : > { %v321_v36 = vpop.trf.xlu0 }
 0x1b6   : > { %v337_v37 = vpack.c.bf16 %v321_v36, %v321_v36 }
 0x1b8   : > { %354 = vst.msk [vmem:[%s894_s7 + $0x30] sm:$0xf] %vm341_vm2, %v337_v37 }
 0x1bd   : > { %v322_v38 = vpop.trf.xlu0 }
 0x1be   : > { %v338_v39 = vpack.c.bf16 %v322_v38, %v322_v38 }
 0x1c0   : > { %355 = vst.msk [vmem:[%s894_s7 + $0x34] sm:$0xf] %vm341_vm2, %v338_v39 }
 0x1c5   : > { %v323_v40 = vpop.trf.xlu0 }
 0x1c6   : > { %v339_v41 = vpack.c.bf16 %v323_v40, %v323_v40 }
 0x1c8   : > { %356 = vst.msk [vmem:[%s894_s7 + $0x38] sm:$0xf] %vm341_vm2, %v339_v41 }
 0x1cd   : > { %v324_v42 = vpop.trf.xlu0 }
 0x1ce   : > { %v340_v43 = vpack.c.bf16 %v324_v42, %v324_v42 }
 0x1d0   : > { %357 = vst.msk [vmem:[%s894_s7 + $0x3c] sm:$0xf] %vm341_vm2, %v340_v43 }
 0x1d1 PF: > { %p543_p9 = scmp.ge.s32.totalorder %s739_s22, 2  ;;  %s400_s0 = sand.u32 1, %s711_s15  }
 0x1d2   : > { %s401_s1 = scalar_lea.sflag [#allocation4], %s400_s0 }
 0x1d3   : > { %p539_p1 = pnand %p543_p9, %p838_p12 }
 0x1d5   : > { %p540_p2 = pneg %p539_p1 }
 0x1d7   : > { %706 = dma.done.wait (%p540_p2), %s401_s1, 32  }
 0x1d8   : > { %708 = vsyncadd (%p540_p2), %s401_s1, 4294967264  ;;  %s21_s22 = sadd.s32 1, %s739_s22   ;;  %s973_s5 = sld [smem:[#allocation8_spill]] }
 0x1d9   : > { %p18_p4 = scmp.ge.s32.totalorder %s21_s22, 6   ;;  %s974_s11 = sld [smem:[#allocation9_spill]] }
 0x1da   : > { %s975_s15 = smov %s715_s16  ;;  %s976_s16 = smov %s719_s17 }
 0x1db   : > { %s977_s17 = smov %s845_s10  ;;  %s978_s18 = smov %s731_s20 }
 0x1dc   : > { %s979_s19 = smov %s735_s21  ;;  %20 = sbr.rel (!%p18_p4) target bundleno = 10 (0xa), region = 89 }
 0x1de   : > { %s980_s20 = smov %s973_s5 }
 0x1df   : > { %s981_s21 = smov %s974_s11 }
 0x1e1   :  { %419 = vsyncpa [#allocation3], 1 }
 0x1e2   :  { %421 = vsyncpa [#allocation3 + $0x1], 1 }
 0x1e3   :  { %422 = vsyncpa [#allocation4], 1 }
 0x1e4   :  { %424 = vsyncpa [#allocation4 + $0x1], 1 }

</bundles_post_ra>
